<compile_context>
chip_gen: v6e
topology: v6e:2x2x1
jax: 0.10.0
libtpu: 0.0.40
codegen_flags: <defaults>
</compile_context>

<pallas_src>
import jax
import jax.numpy as jnp
from jax.experimental import pallas as pl
from jax.experimental.pallas import tpu as pltpu


# --------------------------------------------------------------------------
# Kernel
# --------------------------------------------------------------------------
def reduced_linear_kernel(x_ref, w1_ref, vt_ref, b_ref, o_ref, t_ref):
    # Matmul-1 is computed once per row tile (at j == 0) and cached in VMEM
    # scratch; it is reused for every out_features tile along the j axis.
    @pl.when(pl.program_id(1) == 0)
    def _():
        t = jnp.dot(x_ref[...], w1_ref[...],
                    preferred_element_type=jnp.float32)
        t_ref[...] = t.astype(t_ref.dtype)

    # Matmul-2: (tm, r_pad) @ (r_pad, tn) with f32 accumulation on the MXU.
    out = jnp.dot(t_ref[...], vt_ref[...],
                  preferred_element_type=jnp.float32)
    # Bias is staged as f32 already -> plain f32 add, then one cast on store.
    o_ref[...] = (out + b_ref[...]).astype(o_ref.dtype)


# --------------------------------------------------------------------------
# Wrapper helpers
# --------------------------------------------------------------------------
def _round_up(n, m):
    return ((n + m - 1) // m) * m


def _sublane_multiple(dtype):
    # Sub-32-bit dtypes pack along sublanes: bf16 vreg is (16,128), int8/fp8 (32,128).
    return {4: 8, 2: 16, 1: 32}.get(jnp.dtype(dtype).itemsize, 8)


def _default_vmem_limit():
    cap = 64 << 20
    try:
        info = pltpu.get_tpu_info()
        cap = int(getattr(info, "vmem_capacity_bytes", cap))
    except Exception:
        pass
    # ~48 MiB on v7x (64 MiB physical), ~96 MiB on v5e/v6e (128 MiB physical).
    return min(cap * 3 // 4, 100 << 20)


def _pick_tn(n_pad, max_tn):
    """Largest multiple of 128 that divides n_pad and is <= max_tn (>=128)."""
    best = 128
    t = 128
    while t <= n_pad:
        if n_pad % t == 0 and t <= max_tn:
            best = t
        t += 128
    return best


def _working_set_bytes(tm, tn, in_f, r_pad, cbytes, obytes):
    # Double-buffered pipeline tiles + single-buffered scratch.
    x_b = 2 * tm * in_f * cbytes
    w1_b = 2 * in_f * r_pad * cbytes
    vt_b = 2 * r_pad * tn * cbytes
    b_b = 2 * tn * 4
    o_b = 2 * tm * tn * obytes
    t_b = tm * r_pad * cbytes
    return x_b + w1_b + vt_b + b_b + o_b + t_b


def prepare_reduced_linear_weights(U, S, V, b, rank, *,
                                   compute_dtype=jnp.bfloat16):
    """Fold S into U, transpose V, pad/cast to MXU-friendly shapes.

    Call once per weight update and cache; this is weight plumbing that
    should not run on every forward call."""
    out_f = V.shape[0]
    r_pad = _round_up(max(rank, 1), 128)   # MXU-shaped contraction; zeros exact.
    n_pad = _round_up(out_f, 128)          # lane-dense Vt / bias / output.

    W1 = U[:, :rank] @ S[:rank, :rank]     # (in_f, r)
    Vt = V[:, :rank].T                     # (r, out_f)

    W1_p = jnp.pad(W1, ((0, 0), (0, r_pad - rank))).astype(compute_dtype)
    Vt_p = jnp.pad(Vt, ((0, r_pad - rank), (0, n_pad - out_f))).astype(compute_dtype)
    if b is None:
        b = jnp.zeros((out_f,), jnp.float32)
    b2d = jnp.pad(b.astype(jnp.float32), (0, n_pad - out_f)).reshape(1, n_pad)

    return {"W1": W1_p, "Vt": Vt_p, "b": b2d,
            "out_features": out_f, "compute_dtype": compute_dtype}


def reduced_linear_prepared(x, prepared, *, tm=512, tn=None, out_dtype=None,
                            vmem_limit_bytes=None):
    M, in_f = x.shape
    W1_p, Vt_p, b2d = prepared["W1"], prepared["Vt"], prepared["b"]
    out_f = prepared["out_features"]
    compute_dtype = prepared["compute_dtype"]
    r_pad = W1_p.shape[1]
    n_pad = Vt_p.shape[1]
    if out_dtype is None:
        out_dtype = x.dtype

    cbytes = jnp.dtype(compute_dtype).itemsize
    obytes = jnp.dtype(out_dtype).itemsize
    if vmem_limit_bytes is None:
        vmem_limit_bytes = _default_vmem_limit()
    budget = int(vmem_limit_bytes * 0.85)

    # Tile planning: tm rounded to the dtype's sublane multiple, tn a
    # divisor of n_pad (full-N preferred), both shrunk to fit the budget.
    sub = _sublane_multiple(compute_dtype)
    tm_eff = min(_round_up(tm, sub), _round_up(M, sub))
    tn_eff = n_pad if tn is None else _pick_tn(n_pad, _round_up(tn, 128))

    while (_working_set_bytes(tm_eff, tn_eff, in_f, r_pad, cbytes, obytes)
           > budget and tn_eff > 128):
        tn_eff = _pick_tn(n_pad, tn_eff - 128)
    while (_working_set_bytes(tm_eff, tn_eff, in_f, r_pad, cbytes, obytes)
           > budget and tm_eff > sub):
        tm_eff = max(sub, _round_up(tm_eff // 2, sub))

    m_pad = _round_up(M, tm_eff)
    x_p = x if m_pad == M else jnp.pad(x, ((0, m_pad - M), (0, 0)))
    x_p = x_p.astype(compute_dtype)

    grid = (m_pad // tm_eff, n_pad // tn_eff)

    out = pl.pallas_call(
        reduced_linear_kernel,
        out_shape=jax.ShapeDtypeStruct((m_pad, n_pad), out_dtype),
        grid_spec=pltpu.PrefetchScalarGridSpec(
            num_scalar_prefetch=0,
            grid=grid,
            in_specs=[
                pl.BlockSpec((tm_eff, in_f), lambda i, j: (i, 0)),   # x row tile
                pl.BlockSpec((in_f, r_pad), lambda i, j: (0, 0)),    # U_r @ S_r (resident)
                pl.BlockSpec((r_pad, tn_eff), lambda i, j: (0, j)),  # V_r^T tile
                pl.BlockSpec((1, tn_eff), lambda i, j: (0, j)),      # bias tile (f32)
            ],
            out_specs=pl.BlockSpec((tm_eff, tn_eff), lambda i, j: (i, j)),
            scratch_shapes=[pltpu.VMEM((tm_eff, r_pad), compute_dtype)],
        ),
        compiler_params=pltpu.CompilerParams(
            # i (rows) is independent -> parallel (megacore split on v7x);
            # j carries the cached-intermediate scratch -> must be arbitrary.
            dimension_semantics=("parallel", "arbitrary"),
            vmem_limit_bytes=int(vmem_limit_bytes),
        ),
    )(x_p, W1_p, Vt_p, b2d)

    if m_pad != M or n_pad != out_f:
        out = out[:M, :out_f]
    return out


def reduced_linear(x, U, S, V, b, rank, *, tm=512, tn=None,
                   compute_dtype=jnp.bfloat16, out_dtype=None,
                   vmem_limit_bytes=None):
    """Convenience one-shot forward (prepares weights on every call).

    For inference, call prepare_reduced_linear_weights() once and reuse the
    result with reduced_linear_prepared()."""
    prepared = prepare_reduced_linear_weights(
        U, S, V, b, rank, compute_dtype=compute_dtype)
    return reduced_linear_prepared(x, prepared, tm=tm, tn=tn,
                                   out_dtype=out_dtype,
                                   vmem_limit_bytes=vmem_limit_bytes)


# TODO(synk): step() (QR re-orthogonalization of U/V) is training-time
# housekeeping with no kernel-side equivalent; do it in plain JAX on the host.


def _orthogonal(key, rows, cols):
    """Deterministic orthogonal init (matches nn.init.orthogonal_ semantics)."""
    a = jax.random.normal(key, (max(rows, cols), min(rows, cols)), jnp.float32)
    q, r = jnp.linalg.qr(a)
    q = q * jnp.sign(jnp.diag(r))[None, :]
    if rows < cols:
        q = q.T
    return q[:rows, :cols]


if __name__ == "__main__":
    # Small shapes consistent with the module's forward; chosen so that the
    # M / out_f / rank padding paths and a multi-step grid are exercised.
    batch = 200
    in_features = 192
    out_features = 160
    rank_req = 24
    rank = min(rank_req, in_features, out_features)   # = 24
    rmax = rank_req

    key = jax.random.PRNGKey(0)
    k_u, k_v, k_s, k_x = jax.random.split(key, 4)

    # Deterministic parameter init mirroring __init__.
    U = _orthogonal(k_u, in_features, rmax)                         # (in_f, rmax)
    V = _orthogonal(k_v, out_features, rmax)                        # (out_f, rmax)
    s_diag = jax.random.uniform(k_s, (rmax,), jnp.float32, 0.1, 1.0)
    S = jnp.diag(s_diag)                                            # (rmax, rmax)
    b = jnp.zeros((out_features,), jnp.float32)

    x = jax.random.normal(k_x, (batch, in_features), jnp.float32)

    # Pure-JAX reference.
    ref = ((x @ U[:, :rank]) @ S[:rank, :rank]) @ V[:, :rank].T + b

    # --- bf16 compute / f32 accumulate path with cached prepared weights ---
    # (full-N output tile: grid = (1, 1), Vt / bias truly resident)
    prepared_bf16 = prepare_reduced_linear_weights(
        U, S, V, b, rank, compute_dtype=jnp.bfloat16)
    out_bf16 = reduced_linear_prepared(x, prepared_bf16)
    out_bf16 = jax.block_until_ready(out_bf16)
    assert out_bf16.shape == (batch, out_features)
    assert jnp.allclose(out_bf16, ref, atol=2e-2, rtol=2e-2)

    # --- full-f32 path with small tiles to exercise grid=(2,2), i.e. the
    # scratch-cached intermediate being reused across the j axis, plus the
    # M and out_features padding paths.  Tight numerical check. ---
    out_f32 = reduced_linear(x, U, S, V, b, rank, tm=128, tn=128,
                             compute_dtype=jnp.float32)
    out_f32 = jax.block_until_ready(out_f32)
    assert jnp.allclose(out_f32, ref, atol=1e-4, rtol=1e-4)

    print("KERNEL_OK")
</pallas_src>

<mosaic_0001>
module attributes {stable_mosaic.version = 11 : i64} {
  func.func @reduced_linear_kernel(%arg0: i32, %arg1: i32, %arg2: memref<208x192xbf16, #tpu.memory_space<vmem>>, %arg3: memref<192x128xbf16, #tpu.memory_space<vmem>>, %arg4: memref<128x256xbf16, #tpu.memory_space<vmem>>, %arg5: memref<1x256xf32, #tpu.memory_space<vmem>>, %arg6: memref<208x256xf32, #tpu.memory_space<vmem>>, %arg7: memref<208x128xbf16, #tpu.memory_space<vmem>>) attributes {dimension_semantics = [#tpu.dimension_semantics<parallel>, #tpu.dimension_semantics<arbitrary>], iteration_bounds = array<i64: 1, 1>, scalar_prefetch = 0 : i64, scratch_operands = 1 : i64, tpu.core_type = #tpu.core_type<tc>, window_params = [{transform_indices = @transform_0, window_bounds = array<i64: 208, 192>}, {pipeline_mode = #tpu.pipeline_mode<synchronous>, transform_indices = @transform_1, window_bounds = array<i64: 192, 128>}, {transform_indices = @transform_2, window_bounds = array<i64: 128, 256>}, {transform_indices = @transform_3, window_bounds = array<i64: 1, 256>}, {transform_indices = @transform_4, window_bounds = array<i64: 208, 256>}]} {
    %c0_i32 = arith.constant 0 : i32
    %0 = arith.cmpi eq, %arg1, %c0_i32 : i32
    %1 = arith.extui %0 : i1 to i32
    %c0_i32_0 = arith.constant 0 : i32
    %2 = arith.cmpi ne, %1, %c0_i32_0 : i32
    scf.if %2 {
      %c0_8 = arith.constant 0 : index
      %c0_9 = arith.constant 0 : index
      %10 = vector.load %arg2[%c0_8, %c0_9] : memref<208x192xbf16, #tpu.memory_space<vmem>>, vector<208x192xbf16>
      %c0_10 = arith.constant 0 : index
      %c0_11 = arith.constant 0 : index
      %11 = vector.load %arg3[%c0_10, %c0_11] : memref<192x128xbf16, #tpu.memory_space<vmem>>, vector<192x128xbf16>
      %cst_12 = arith.constant dense<0.000000e+00> : vector<208x128xf32>
      %12 = tpu.matmul %10, %11, %cst_12 {dimension_numbers = #tpu.dot_dimension_numbers<[1], [0], [0], [1], [0, 0, 1, 1], [], []>} : vector<208x192xbf16>, vector<192x128xbf16>, vector<208x128xf32> -> vector<208x128xf32>
      %13 = arith.truncf %12 : vector<208x128xf32> to vector<208x128xbf16>
      %c0_13 = arith.constant 0 : index
      %c0_14 = arith.constant 0 : index
      %14 = vector.load %arg7[%c0_13, %c0_14] : memref<208x128xbf16, #tpu.memory_space<vmem>>, vector<208x128xbf16>
      tpu.vector_store %arg7[%c0_13, %c0_14], %13 {strides = array<i32>} : memref<208x128xbf16, #tpu.memory_space<vmem>>, vector<208x128xbf16>,
    } else {
    }
    %c0 = arith.constant 0 : index
    %c0_1 = arith.constant 0 : index
    %3 = vector.load %arg7[%c0, %c0_1] : memref<208x128xbf16, #tpu.memory_space<vmem>>, vector<208x128xbf16>
    %c0_2 = arith.constant 0 : index
    %c0_3 = arith.constant 0 : index
    %4 = vector.load %arg4[%c0_2, %c0_3] : memref<128x256xbf16, #tpu.memory_space<vmem>>, vector<128x256xbf16>
    %cst = arith.constant dense<0.000000e+00> : vector<208x256xf32>
    %5 = tpu.matmul %3, %4, %cst {dimension_numbers = #tpu.dot_dimension_numbers<[1], [0], [0], [1], [0, 0, 1, 1], [], []>} : vector<208x128xbf16>, vector<128x256xbf16>, vector<208x256xf32> -> vector<208x256xf32>
    %c0_4 = arith.constant 0 : index
    %c0_5 = arith.constant 0 : index
    %6 = vector.load %arg5[%c0_4, %c0_5] : memref<1x256xf32, #tpu.memory_space<vmem>>, vector<1x256xf32>
    %7 = vector.broadcast %6 : vector<1x256xf32> to vector<208x256xf32>
    %8 = arith.addf %5, %7 : vector<208x256xf32>
    %c0_6 = arith.constant 0 : index
    %c0_7 = arith.constant 0 : index
    %9 = vector.load %arg6[%c0_6, %c0_7] : memref<208x256xf32, #tpu.memory_space<vmem>>, vector<208x256xf32>
    tpu.vector_store %arg6[%c0_6, %c0_7], %8 {strides = array<i32>} : memref<208x256xf32, #tpu.memory_space<vmem>>, vector<208x256xf32>,
    return
  }
  func.func @transform_0(%arg0: i32, %arg1: i32) -> (i32, i32) {
    %c0_i32 = arith.constant 0 : i32
    %c0_i32_0 = arith.constant 0 : i32
    return %arg0, %c0_i32 : i32, i32
  }
  func.func @transform_1(%arg0: i32, %arg1: i32) -> (i32, i32) {
    %c0_i32 = arith.constant 0 : i32
    %c0_i32_0 = arith.constant 0 : i32
    %c0_i32_1 = arith.constant 0 : i32
    return %c0_i32, %c0_i32_0 : i32, i32
  }
  func.func @transform_2(%arg0: i32, %arg1: i32) -> (i32, i32) {
    %c0_i32 = arith.constant 0 : i32
    %c0_i32_0 = arith.constant 0 : i32
    return %c0_i32, %arg1 : i32, i32
  }
  func.func @transform_3(%arg0: i32, %arg1: i32) -> (i32, i32) {
    %c0_i32 = arith.constant 0 : i32
    %c0_i32_0 = arith.constant 0 : i32
    return %c0_i32, %arg1 : i32, i32
  }
  func.func @transform_4(%arg0: i32, %arg1: i32) -> (i32, i32) {
    %c0_i32 = arith.constant 0 : i32
    return %arg0, %arg1 : i32, i32
  }
}

</mosaic_0001>

<bundles_post_ra>
// kernel: tpu_custom_call.1
= control target key start
LH: loop header
LB: loop body
LE: loop exit
PB: predicated region body
PF: predicated region fallthrough
CT: control target
= control target key end

     0   :  { %v1335_v1 = vmov 0   ;;  %vm262_vm0 = vcmask 523264   ;;  %s1626_s0 = inlined_call_operand.vmem [shape: bf16[208,192], index: 0, kind: input, shape index: {}]   ;;  %s1627_s1 = inlined_call_operand.vmem [shape: bf16[192,128], index: 1, kind: input, shape index: {}]   ;;  %s1628_s2 = inlined_call_operand.vmem [shape: bf16[128,256], index: 2, kind: input, shape index: {}]   ;;  %s1629_s3 = inlined_call_operand.vmem [shape: f32[1,256], index: 3, kind: input, shape index: {}]   ;;  %s1630_s4 = inlined_call_operand.hbm [shape: f32[208,256], index: 4, kind: output, shape index: {}]  }
   0x1   :  { %v1225_v0 = vld [vmem:[%s1627_s1 + $0x38] sm:$0xff]   ;;  %302 = vmatprep.subr.bf16.mxu0 %v1335_v1  ;;  %813 = vmatprep.mubr.bf16.mxu1 %v1335_v1  ;;  %v1226_v2 = vld [vmem:[%s1627_s1 + $0x30] sm:$0xff]   ;;  %v1227_v3 = vld [vmem:[%s1627_s1 + $0x28] sm:$0xff]  }
   0x2   :  { %303 = vmatpush1.bf16.msra.mxu0 %v1225_v0  ;;  %v1228_v4 = vld [vmem:[%s1627_s1 + $0x20] sm:$0xff]   ;;  %v1229_v6 = vld [vmem:[%s1627_s1 + $0x18] sm:$0xff]   ;;  %v1230_v7 = vld [vmem:[%s1627_s1 + $0x10] sm:$0xff]  }
   0x3   :  { %304 = vmatprep.subr.bf16.mxu0 %v1335_v1  ;;  %v1239_v5 = vld [vmem:[%s1626_s0 + $0x4] ss:$8 sps:$4 sm:$0xff]   ;;  %v1233_v10 = vld [vmem:[%s1627_s1 + $0x58] sm:$0xff]   ;;  %v1281_v14 = vld [vmem:[%s1628_s2 + $0x60] ss:$8 sps:$4 sm:$0xff]  }
   0x4   :  { %1050 = vmatprep.mubr.msk.bf16.mxu0 %vm262_vm0, %v1239_v5  ;;  %v1231_v8 = vld [vmem:[%s1627_s1 + $0x8] sm:$0xff]   ;;  %v1232_v9 = vld [vmem:[%s1627_s1] sm:$0xff]   ;;  %v1276_v11 = vld [vmem:[%s1628_s2 + $0x74] ss:$8 sps:$4 sm:$0xff]  }
   0x5   :  { %v1278_v12 = vld [vmem:[%s1628_s2 + $0x70] ss:$8 sps:$4 sm:$0xff]   ;;  %v1279_v13 = vld [vmem:[%s1628_s2 + $0x64] ss:$8 sps:$4 sm:$0xff]   ;;  %781 = vmatprep.subr.bf16.mxu1 %v1276_v11  ;;  %v1282_v16 = vld [vmem:[%s1628_s2 + $0x54] ss:$8 sps:$4 sm:$0xff]  }
   0x6   :  { %305 = vmatpush1.bf16.msra.mxu0 %v1226_v2  ;;  %782 = vmatpush1.bf16.msra.mxu1 %v1278_v12  ;;  %v1234_v15 = vld [vmem:[%s1627_s1 + $0x50] sm:$0xff]  }
   0x7   :  { %306 = vmatprep.subr.bf16.mxu0 %v1335_v1  ;;  %783 = vmatprep.subr.bf16.mxu1 %v1279_v13  ;;  %v1284_v17 = vld [vmem:[%s1628_s2 + $0x50] ss:$8 sps:$4 sm:$0xff]  }
   0xa   :  { %307 = vmatpush1.bf16.msra.mxu0 %v1227_v3  ;;  %784 = vmatpush1.bf16.msra.mxu1 %v1281_v14 }
   0xb   :  { %308 = vmatprep.subr.bf16.mxu0 %v1335_v1 }
   0xe   :  { %309 = vmatpush1.bf16.msra.mxu0 %v1228_v4 }
   0xf   :  { %310 = vmatprep.subr.bf16.mxu0 %v1335_v1 }
  0x12   :  { %311 = vmatpush1.bf16.msra.mxu0 %v1229_v6 }
  0x13   :  { %312 = vmatprep.subr.bf16.mxu0 %v1335_v1 }
  0x16   :  { %313 = vmatpush1.bf16.msra.mxu0 %v1230_v7 }
  0x17   :  { %314 = vmatprep.subr.bf16.mxu0 %v1335_v1 }
  0x1a   :  { %315 = vmatpush1.bf16.msra.mxu0 %v1231_v8 }
  0x1b   :  { %316 = vmatprep.subr.bf16.mxu0 %v1335_v1 }
  0x1e   :  { %317 = vmatpush1.bf16.msra.mxu0 %v1232_v9 }
  0x1f   :  { %326 = vmatprep.subr.bf16.mxu0 %v1335_v1 }
  0x22   :  { %327 = vmatpush2.bf16.msra.mxu0 %v1233_v10 }
  0x23   :  { %328 = vmatprep.subr.bf16.mxu0 %v1335_v1 }
  0x24   :  { %9 = vsyncpa [#allocation4], 0  ;;  %v1235_v18 = vld [vmem:[%s1627_s1 + $0x48] sm:$0xff]   ;;  %785 = vmatprep.subr.bf16.mxu1 %v1282_v16  ;;  %v1236_v21 = vld [vmem:[%s1627_s1 + $0x40] sm:$0xff]  }
  0x25   :  { %v1285_v19 = vld [vmem:[%s1628_s2 + $0x44] ss:$8 sps:$4 sm:$0xff]   ;;  %786 = vmatpush1.bf16.msra.mxu1 %v1284_v17  ;;  %v1287_v20 = vld [vmem:[%s1628_s2 + $0x40] ss:$8 sps:$4 sm:$0xff]   ;;  %v1240_v23 = vld [vmem:[%s1626_s0 + $0x14] ss:$8 sps:$4 sm:$0xff]  }
  0x26   :  { %329 = vmatpush2.bf16.msra.mxu0 %v1234_v15  ;;  %787 = vmatprep.subr.bf16.mxu1 %v1285_v19  ;;  %v1237_v22 = vld [vmem:[%s1626_s0] ss:$8 sps:$4 sm:$0xff]   ;;  %v1242_v24 = vld [vmem:[%s1626_s0 + $0x10] ss:$8 sps:$4 sm:$0xff]   ;;  %v1243_v25 = vld [vmem:[%s1626_s0 + $0x24] ss:$8 sps:$4 sm:$0xff]  }
  0x27   :  { %330 = vmatprep.subr.bf16.mxu0 %v1335_v1  ;;  %v1245_v26 = vld [vmem:[%s1626_s0 + $0x20] ss:$8 sps:$4 sm:$0xff]   ;;  %v1246_v27 = vld [vmem:[%s1626_s0 + $0x34] ss:$8 sps:$4 sm:$0xff]   ;;  %v1248_v28 = vld [vmem:[%s1626_s0 + $0x30] ss:$8 sps:$4 sm:$0xff]  }
  0x28   :  { %v1249_v29 = vld [vmem:[%s1626_s0 + $0x44] ss:$8 sps:$4 sm:$0xff]   ;;  %v1251_v30 = vld [vmem:[%s1626_s0 + $0x40] ss:$8 sps:$4 sm:$0xff]   ;;  %v1252_v31 = vld [vmem:[%s1626_s0 + $0x54] ss:$8 sps:$4 sm:$0xff]  }
  0x29   :  { %788 = vmatpush1.bf16.msra.mxu1 %v1287_v20  ;;  %v1254_v32 = vld [vmem:[%s1626_s0 + $0x50] ss:$8 sps:$4 sm:$0xff]   ;;  %v1255_v33 = vld [vmem:[%s1626_s0 + $0x64] ss:$8 sps:$4 sm:$0xff]   ;;  %v1257_v34 = vld [vmem:[%s1626_s0 + $0x60] ss:$8 sps:$4 sm:$0xff]  }
  0x2a   :  { %331 = vmatpush2.bf16.msra.mxu0 %v1235_v18  ;;  %v1258_v35 = vld [vmem:[%s1626_s0 + $0x74] ss:$8 sps:$4 sm:$0xff]   ;;  %v1260_v36 = vld [vmem:[%s1626_s0 + $0x70] ss:$8 sps:$4 sm:$0xff]   ;;  %v1261_v37 = vld [vmem:[%s1626_s0 + $0x84] ss:$8 sps:$4 sm:$0xff]  }
  0x2b   :  { %332 = vmatprep.subr.bf16.mxu0 %v1335_v1  ;;  %v1263_v38 = vld [vmem:[%s1626_s0 + $0x80] ss:$8 sps:$4 sm:$0xff]   ;;  %v1264_v39 = vld [vmem:[%s1626_s0 + $0x94] ss:$8 sps:$4 sm:$0xff]   ;;  %v1290_v41 = vld [vmem:[%s1628_s2 + $0x30] ss:$8 sps:$4 sm:$0xff]  }
  0x2c   :  { %v1288_v40 = vld [vmem:[%s1628_s2 + $0x34] ss:$8 sps:$4 sm:$0xff]   ;;  %v1291_v42 = vld [vmem:[%s1628_s2 + $0x24] ss:$8 sps:$4 sm:$0xff]   ;;  %v1293_v43 = vld [vmem:[%s1628_s2 + $0x20] ss:$8 sps:$4 sm:$0xff]  }
  0x2d   :  { %789 = vmatprep.subr.bf16.mxu1 %v1288_v40  ;;  %v1266_v44 = vld [vmem:[%s1626_s0 + $0x90] ss:$8 sps:$4 sm:$0xff]   ;;  %v1267_v45 = vld [vmem:[%s1626_s0 + $0xa4] ss:$8 sps:$4 sm:$0xff]   ;;  %v1294_v46 = vld [vmem:[%s1628_s2 + $0x14] ss:$8 sps:$4 sm:$0xff]  }
  0x2e   :  { %333 = vmatpush2.bf16.msra.mxu0 %v1236_v21  ;;  %790 = vmatpush1.bf16.msra.mxu1 %v1290_v41  ;;  %v1296_v47 = vld [vmem:[%s1628_s2 + $0x10] ss:$8 sps:$4 sm:$0xff]   ;;  %v1297_v48 = vld [vmem:[%s1628_s2 + $0x4] ss:$8 sps:$4 sm:$0xff]   ;;  %v1299_v49 = vld [vmem:[%s1628_s2] ss:$8 sps:$4 sm:$0xff]  }
  0x2f   :  { %791 = vmatprep.subr.bf16.mxu1 %v1291_v42  ;;  %v1269_v50 = vld [vmem:[%s1626_s0 + $0xa0] ss:$8 sps:$4 sm:$0xff]   ;;  %v1270_v51 = vld [vmem:[%s1626_s0 + $0xb4] ss:$8 sps:$4 sm:$0xff]   ;;  %v1272_v52 = vld [vmem:[%s1626_s0 + $0xb0] ss:$8 sps:$4 sm:$0xff]  }
  0x30   :  { %v1273_v53 = vld [vmem:[%s1626_s0 + $0xc4] ss:$8 sps:$4 sm:$0xff]   ;;  %v1275_v54 = vld [vmem:[%s1626_s0 + $0xc0] ss:$8 sps:$4 sm:$0xff]  }
  0x31   :  { %335 = vmatmul.mubr.bf16.vlgmr.msra.gmra.mxu0 %v1237_v22 }
  0x32   :  { %1051 = vmatprep.mubr.msk.bf16.mxu0 %vm262_vm0, %v1240_v23  ;;  %792 = vmatpush1.bf16.msra.mxu1 %v1293_v43 }
  0x33   :  { %793 = vmatprep.subr.bf16.mxu1 %v1294_v46 }
  0x36   :  { %794 = vmatpush1.bf16.msra.mxu1 %v1296_v47 }
  0x37   :  { %795 = vmatprep.subr.bf16.mxu1 %v1297_v48 }
  0x39   :  { %343 = vmatmul.mubr.bf16.gmra.mxu0 %v1242_v24 }
  0x3a   :  { %1052 = vmatprep.mubr.msk.bf16.mxu0 %vm262_vm0, %v1243_v25  ;;  %796 = vmatpush1.bf16.msra.mxu1 %v1299_v49 }
  0x41   :  { %351 = vmatmul.mubr.bf16.gmra.mxu0 %v1245_v26 }
  0x42   :  { %1053 = vmatprep.mubr.msk.bf16.mxu0 %vm262_vm0, %v1246_v27 }
  0x49   :  { %359 = vmatmul.mubr.bf16.gmra.mxu0 %v1248_v28 }
  0x4a   :  { %1054 = vmatprep.mubr.msk.bf16.mxu0 %vm262_vm0, %v1249_v29 }
  0x51   :  { %367 = vmatmul.mubr.bf16.gmra.mxu0 %v1251_v30 }
  0x52   :  { %1055 = vmatprep.mubr.msk.bf16.mxu0 %vm262_vm0, %v1252_v31 }
  0x59   :  { %375 = vmatmul.mubr.bf16.gmra.mxu0 %v1254_v32 }
  0x5a   :  { %1056 = vmatprep.mubr.msk.bf16.mxu0 %vm262_vm0, %v1255_v33 }
  0x61   :  { %383 = vmatmul.mubr.bf16.gmra.mxu0 %v1257_v34 }
  0x62   :  { %1057 = vmatprep.mubr.msk.bf16.mxu0 %vm262_vm0, %v1258_v35 }
  0x69   :  { %391 = vmatmul.mubr.bf16.gmra.mxu0 %v1260_v36 }
  0x6a   :  { %1058 = vmatprep.mubr.msk.bf16.mxu0 %vm262_vm0, %v1261_v37 }
  0x71   :  { %399 = vmatmul.mubr.bf16.gmra.mxu0 %v1263_v38 }
  0x72   :  { %1059 = vmatprep.mubr.msk.bf16.mxu0 %vm262_vm0, %v1264_v39 }
  0x79   :  { %407 = vmatmul.mubr.bf16.gmra.mxu0 %v1266_v44 }
  0x7a   :  { %1060 = vmatprep.mubr.msk.bf16.mxu0 %vm262_vm0, %v1267_v45 }
  0x81   :  { %415 = vmatmul.mubr.bf16.gmra.mxu0 %v1269_v50 }
  0x82   :  { %1061 = vmatprep.mubr.msk.bf16.mxu0 %vm262_vm0, %v1270_v51 }
  0x89   :  { %423 = vmatmul.mubr.bf16.gmra.mxu0 %v1272_v52 }
  0x8a   :  { %1062 = vmatprep.mubr.msk.bf16.mxu0 %vm262_vm0, %v1273_v53 }
  0x91   :  { %431 = vmatmul.mubr.bf16.gmra.mxu0 %v1275_v54 }
  0xf1   :  { %v336_v55 = vpop.f32.mrf.mxu0 }
  0xf3   :  { %v338_v56 = vpop.f32.mrf.mxu0 }
  0xf5   :  { %v339_v57 = vpop.f32.mrf.mxu0 }
  0xf6   :  { %v1147_v58 = vpack.c.bf16 %v339_v57, %v336_v55 }
  0xf7   :  { %v341_v59 = vpop.f32.mrf.mxu0 }
  0xf8   :  { %1148 = vst [vmem:[#allocation2] sm:$0xff] %v1147_v58  }
  0xf9   :  { %v344_v60 = vpop.f32.mrf.mxu0 }
  0xfb   :  { %v346_v61 = vpop.f32.mrf.mxu0 }
  0xfd   :  { %v347_v62 = vpop.f32.mrf.mxu0 }
  0xfe   :  { %v1152_v63 = vpack.c.bf16 %v347_v62, %v344_v60 }
  0xff   :  { %v349_v0 = vpop.f32.mrf.mxu0  ;;  %v1300_v2 = vld [vmem:[#allocation2] sm:$0xff]  }
 0x100   :  { %1209 = vst [vmem:[#allocation2 + $0x8] sm:$0xff] %v1152_v63   ;;  %814 = vmatmul.mubr.bf16.vlgmr.msra.gmra.mxu1 %v1300_v2 }
 0x101   :  { %v352_v3 = vpop.f32.mrf.mxu0  ;;  %823 = vmatprep.mubr.bf16.mxu1 %v1335_v1 }
 0x103   :  { %v354_v4 = vpop.f32.mrf.mxu0 }
 0x105   :  { %v355_v5 = vpop.f32.mrf.mxu0 }
 0x106   :  { %v1157_v6 = vpack.c.bf16 %v355_v5, %v352_v3 }
 0x107   :  { %v357_v7 = vpop.f32.mrf.mxu0  ;;  %v1301_v8 = vld [vmem:[#allocation2 + $0x8] sm:$0xff]  }
 0x108   :  { %1210 = vst [vmem:[#allocation2 + $0x10] sm:$0xff] %v1157_v6   ;;  %824 = vmatmul.mubr.bf16.gmra.mxu1 %v1301_v8  ;;  %v613_v7 = vlaneseq }
 0x109   :  { %v360_v9 = vpop.f32.mrf.mxu0  ;;  %833 = vmatprep.mubr.bf16.mxu1 %v1335_v1 }
 0x10a   :  { %v614_v8 = vshrl.u32 %v613_v7, 7 }
 0x10b   :  { %v362_v10 = vpop.f32.mrf.mxu0 }
 0x10c   :  { %v611_v10 = vld [vmem:[%s1629_s3] sm:$0x3]  ;;  %s1336_s3 = smov [#allocation3]  }
 0x10d   :  { %v363_v11 = vpop.f32.mrf.mxu0  ;;  %s1001_s16 = sshll.u32 %s1336_s3, 4  ;;  %s1002_s16 = int_to_ptr.vmem [resolvable:$true] %s1001_s16 }
 0x10e   :  { %v1162_v12 = vpack.c.bf16 %v363_v11, %v360_v9  ;;  %v615_v9 = vsub.s32 0, %v614_v8  ;;  %v619_v11 = vsub.s32 1, %v614_v8  ;;  %s1313_s17 = scalar_lea.vmem %s1002_s16, 6656  ;;  %p1318_p1 = scmp.lt.s32.totalorder %s1002_s16, %s1002_s16 }
 0x10f   :  { %v365_v13 = vpop.f32.mrf.mxu0  ;;  %v1302_v14 = vld [vmem:[#allocation2 + $0x10] sm:$0xff]   ;;  %p1314_p0 = scmp.ne.s32.totalorder %s1002_s16, %s1313_s17  ;;  %p1319_p2 = scmp.lt.s32.totalorder %s1313_s17, %s1313_s17 }
 0x110   :  { %1211 = vst [vmem:[#allocation2 + $0x18] sm:$0xff] %v1162_v12   ;;  %834 = vmatmul.mubr.bf16.gmra.mxu1 %v1302_v14  ;;  %v1567_v12 = vrot.slane %v611_v10, %v615_v9  ;;  %v1569_v13 = vrot.slane %v611_v10, %v619_v11 }
 0x111   :  { %v368_v15 = vpop.f32.mrf.mxu0  ;;  %843 = vmatprep.mubr.bf16.mxu1 %v1335_v1  ;;  %p1320_p3 = por %p1319_p2, %p1318_p1 }
 0x113   :  { %v370_v16 = vpop.f32.mrf.mxu0  ;;  %p1321_p4 = pnand %p1320_p3, %p1314_p0 }
 0x115   :  { %v371_v17 = vpop.f32.mrf.mxu0 }
 0x116   :  { %v1167_v18 = vpack.c.bf16 %v371_v17, %v368_v15 }
 0x117   :  { %v373_v19 = vpop.f32.mrf.mxu0  ;;  %v1303_v20 = vld [vmem:[#allocation2 + $0x18] sm:$0xff]  }
 0x118   :  { %1212 = vst [vmem:[#allocation2 + $0x20] sm:$0xff] %v1167_v18   ;;  %844 = vmatmul.mubr.bf16.gmra.mxu1 %v1303_v20 }
 0x119   :  { %v376_v21 = vpop.f32.mrf.mxu0  ;;  %853 = vmatprep.mubr.bf16.mxu1 %v1335_v1 }
 0x11b   :  { %v378_v22 = vpop.f32.mrf.mxu0 }
 0x11d   :  { %v379_v23 = vpop.f32.mrf.mxu0 }
 0x11e   :  { %v1172_v24 = vpack.c.bf16 %v379_v23, %v376_v21 }
 0x11f   :  { %v381_v25 = vpop.f32.mrf.mxu0  ;;  %v1304_v26 = vld [vmem:[#allocation2 + $0x20] sm:$0xff]  }
 0x120   :  { %1213 = vst [vmem:[#allocation2 + $0x28] sm:$0xff] %v1172_v24   ;;  %854 = vmatmul.mubr.bf16.gmra.mxu1 %v1304_v26 }
 0x121   :  { %v384_v27 = vpop.f32.mrf.mxu0  ;;  %863 = vmatprep.mubr.bf16.mxu1 %v1335_v1 }
 0x123   :  { %v386_v28 = vpop.f32.mrf.mxu0 }
 0x125   :  { %v387_v29 = vpop.f32.mrf.mxu0 }
 0x126   :  { %v1177_v30 = vpack.c.bf16 %v387_v29, %v384_v27 }
 0x127   :  { %v389_v31 = vpop.f32.mrf.mxu0  ;;  %v1305_v32 = vld [vmem:[#allocation2 + $0x28] sm:$0xff]  }
 0x128   :  { %1214 = vst [vmem:[#allocation2 + $0x30] sm:$0xff] %v1177_v30   ;;  %864 = vmatmul.mubr.bf16.gmra.mxu1 %v1305_v32 }
 0x129   :  { %v392_v33 = vpop.f32.mrf.mxu0  ;;  %873 = vmatprep.mubr.bf16.mxu1 %v1335_v1 }
 0x12b   :  { %v394_v34 = vpop.f32.mrf.mxu0 }
 0x12d   :  { %v395_v35 = vpop.f32.mrf.mxu0 }
 0x12e   :  { %v1182_v36 = vpack.c.bf16 %v395_v35, %v392_v33 }
 0x12f   :  { %v397_v37 = vpop.f32.mrf.mxu0  ;;  %v1306_v38 = vld [vmem:[#allocation2 + $0x30] sm:$0xff]  }
 0x130   :  { %1215 = vst [vmem:[#allocation2 + $0x38] sm:$0xff] %v1182_v36   ;;  %874 = vmatmul.mubr.bf16.gmra.mxu1 %v1306_v38 }
 0x131   :  { %v400_v39 = vpop.f32.mrf.mxu0  ;;  %883 = vmatprep.mubr.bf16.mxu1 %v1335_v1 }
 0x133   :  { %v402_v40 = vpop.f32.mrf.mxu0 }
 0x135   :  { %v403_v41 = vpop.f32.mrf.mxu0 }
 0x136   :  { %v1187_v42 = vpack.c.bf16 %v403_v41, %v400_v39 }
 0x137   :  { %v405_v43 = vpop.f32.mrf.mxu0  ;;  %v1307_v44 = vld [vmem:[#allocation2 + $0x38] sm:$0xff]  }
 0x138   :  { %1216 = vst [vmem:[#allocation2 + $0x40] sm:$0xff] %v1187_v42   ;;  %884 = vmatmul.mubr.bf16.gmra.mxu1 %v1307_v44 }
 0x139   :  { %v408_v45 = vpop.f32.mrf.mxu0  ;;  %893 = vmatprep.mubr.bf16.mxu1 %v1335_v1 }
 0x13b   :  { %v410_v46 = vpop.f32.mrf.mxu0 }
 0x13d   :  { %v411_v47 = vpop.f32.mrf.mxu0 }
 0x13e   :  { %v1192_v48 = vpack.c.bf16 %v411_v47, %v408_v45 }
 0x13f   :  { %v413_v49 = vpop.f32.mrf.mxu0  ;;  %v1308_v50 = vld [vmem:[#allocation2 + $0x40] sm:$0xff]  }
 0x140   :  { %1217 = vst [vmem:[#allocation2 + $0x48] sm:$0xff] %v1192_v48   ;;  %894 = vmatmul.mubr.bf16.gmra.mxu1 %v1308_v50 }
 0x141   :  { %v416_v51 = vpop.f32.mrf.mxu0  ;;  %903 = vmatprep.mubr.bf16.mxu1 %v1335_v1 }
 0x143   :  { %v418_v52 = vpop.f32.mrf.mxu0 }
 0x145   :  { %v419_v53 = vpop.f32.mrf.mxu0 }
 0x146   :  { %v1197_v54 = vpack.c.bf16 %v419_v53, %v416_v51 }
 0x147   :  { %v421_v55 = vpop.f32.mrf.mxu0  ;;  %v1309_v56 = vld [vmem:[#allocation2 + $0x48] sm:$0xff]  }
 0x148   :  { %1218 = vst [vmem:[#allocation2 + $0x50] sm:$0xff] %v1197_v54   ;;  %904 = vmatmul.mubr.bf16.gmra.mxu1 %v1309_v56 }
 0x149   :  { %v424_v57 = vpop.f32.mrf.mxu0  ;;  %913 = vmatprep.mubr.bf16.mxu1 %v1335_v1 }
 0x14b   :  { %v426_v58 = vpop.f32.mrf.mxu0 }
 0x14d   :  { %v427_v59 = vpop.f32.mrf.mxu0 }
 0x14e   :  { %v1202_v60 = vpack.c.bf16 %v427_v59, %v424_v57 }
 0x14f   :  { %v429_v61 = vpop.f32.mrf.mxu0  ;;  %v1310_v62 = vld [vmem:[#allocation2 + $0x50] sm:$0xff]  }
 0x150   :  { %1219 = vst [vmem:[#allocation2 + $0x58] sm:$0xff] %v1202_v60   ;;  %914 = vmatmul.mubr.bf16.gmra.mxu1 %v1310_v62 }
 0x151   :  { %v432_v63 = vpop.f32.mrf.mxu0  ;;  %923 = vmatprep.mubr.bf16.mxu1 %v1335_v1 }
 0x153   :  { %v434_v0 = vpop.f32.mrf.mxu0 }
 0x155   :  { %v435_v2 = vpop.f32.mrf.mxu0 }
 0x156   :  { %v1207_v3 = vpack.c.bf16 %v435_v2, %v432_v63 }
 0x157   :  { %v437_v4 = vpop.f32.mrf.mxu0  ;;  %v1311_v5 = vld [vmem:[#allocation2 + $0x58] sm:$0xff]  }
 0x158   :  { %1220 = vst [vmem:[#allocation2 + $0x60] sm:$0xff] %v1207_v3   ;;  %924 = vmatmul.mubr.bf16.gmra.mxu1 %v1311_v5 }
 0x159   :  { %933 = vmatprep.mubr.bf16.mxu1 %v1335_v1 }
 0x15f   :  { %v1312_v6 = vld [vmem:[#allocation2 + $0x60] sm:$0xff]  }
 0x160   :  { %934 = vmatmul.mubr.bf16.gmra.mxu1 %v1312_v6 }
 0x1c0   :  { %v815_v14 = vpop.f32.mrf.mxu1 }
 0x1c1   :  { %v816_v15 = vadd.f32 %v815_v14, %v1567_v12 }
 0x1c2   :  { %v817_v16 = vpop.f32.mrf.mxu1 }
 0x1c3   :  { %944 = vst [vmem:[#allocation3] sm:$0xff] %v816_v15  ;;  %v818_v1 = vadd.f32 %v817_v16, %v1569_v13 }
 0x1c4   :  { %v819_v17 = vpop.f32.mrf.mxu1 }
 0x1c5   :  { %945 = vst [vmem:[#allocation3 + $0x8] sm:$0xff] %v818_v1  ;;  %v820_v18 = vadd.f32 %v819_v17, %v1567_v12 }
 0x1c6   :  { %v821_v19 = vpop.f32.mrf.mxu1 }
 0x1c7   :  { %946 = vst [vmem:[#allocation3 + $0x10] sm:$0xff] %v820_v18  ;;  %v822_v20 = vadd.f32 %v821_v19, %v1569_v13 }
 0x1c8   :  { %v825_v21 = vpop.f32.mrf.mxu1 }
 0x1c9   :  { %947 = vst [vmem:[#allocation3 + $0x18] sm:$0xff] %v822_v20  ;;  %v826_v22 = vadd.f32 %v825_v21, %v1567_v12 }
 0x1ca   :  { %v827_v23 = vpop.f32.mrf.mxu1 }
 0x1cb   :  { %948 = vst [vmem:[#allocation3 + $0x20] sm:$0xff] %v826_v22  ;;  %v828_v24 = vadd.f32 %v827_v23, %v1569_v13 }
 0x1cc   :  { %v829_v25 = vpop.f32.mrf.mxu1 }
 0x1cd   :  { %949 = vst [vmem:[#allocation3 + $0x28] sm:$0xff] %v828_v24  ;;  %v830_v26 = vadd.f32 %v829_v25, %v1567_v12 }
 0x1ce   :  { %v831_v27 = vpop.f32.mrf.mxu1 }
 0x1cf   :  { %950 = vst [vmem:[#allocation3 + $0x30] sm:$0xff] %v830_v26  ;;  %v832_v28 = vadd.f32 %v831_v27, %v1569_v13 }
 0x1d0   :  { %v835_v29 = vpop.f32.mrf.mxu1 }
 0x1d1   :  { %951 = vst [vmem:[#allocation3 + $0x38] sm:$0xff] %v832_v28  ;;  %v836_v30 = vadd.f32 %v835_v29, %v1567_v12 }
 0x1d2   :  { %v837_v31 = vpop.f32.mrf.mxu1 }
 0x1d3   :  { %952 = vst [vmem:[#allocation3 + $0x40] sm:$0xff] %v836_v30  ;;  %v838_v32 = vadd.f32 %v837_v31, %v1569_v13 }
 0x1d4   :  { %v839_v33 = vpop.f32.mrf.mxu1 }
 0x1d5   :  { %953 = vst [vmem:[#allocation3 + $0x48] sm:$0xff] %v838_v32  ;;  %v840_v34 = vadd.f32 %v839_v33, %v1567_v12 }
 0x1d6   :  { %v841_v35 = vpop.f32.mrf.mxu1 }
 0x1d7   :  { %954 = vst [vmem:[#allocation3 + $0x50] sm:$0xff] %v840_v34  ;;  %v842_v36 = vadd.f32 %v841_v35, %v1569_v13 }
 0x1d8   :  { %v845_v37 = vpop.f32.mrf.mxu1 }
 0x1d9   :  { %955 = vst [vmem:[#allocation3 + $0x58] sm:$0xff] %v842_v36  ;;  %v846_v38 = vadd.f32 %v845_v37, %v1567_v12 }
 0x1da   :  { %v847_v39 = vpop.f32.mrf.mxu1 }
 0x1db   :  { %956 = vst [vmem:[#allocation3 + $0x60] sm:$0xff] %v846_v38  ;;  %v848_v40 = vadd.f32 %v847_v39, %v1569_v13 }
 0x1dc   :  { %v849_v41 = vpop.f32.mrf.mxu1 }
 0x1dd   :  { %957 = vst [vmem:[#allocation3 + $0x68] sm:$0xff] %v848_v40  ;;  %v850_v42 = vadd.f32 %v849_v41, %v1567_v12 }
 0x1de   :  { %v851_v43 = vpop.f32.mrf.mxu1 }
 0x1df   :  { %958 = vst [vmem:[#allocation3 + $0x70] sm:$0xff] %v850_v42  ;;  %v852_v44 = vadd.f32 %v851_v43, %v1569_v13 }
 0x1e0   :  { %v855_v45 = vpop.f32.mrf.mxu1 }
 0x1e1   :  { %959 = vst [vmem:[#allocation3 + $0x78] sm:$0xff] %v852_v44  ;;  %v856_v46 = vadd.f32 %v855_v45, %v1567_v12 }
 0x1e2   :  { %v857_v47 = vpop.f32.mrf.mxu1 }
 0x1e3   :  { %960 = vst [vmem:[#allocation3 + $0x80] sm:$0xff] %v856_v46  ;;  %v858_v48 = vadd.f32 %v857_v47, %v1569_v13 }
 0x1e4   :  { %v859_v49 = vpop.f32.mrf.mxu1 }
 0x1e5   :  { %961 = vst [vmem:[#allocation3 + $0x88] sm:$0xff] %v858_v48  ;;  %v860_v50 = vadd.f32 %v859_v49, %v1567_v12 }
 0x1e6   :  { %v861_v51 = vpop.f32.mrf.mxu1 }
 0x1e7   :  { %962 = vst [vmem:[#allocation3 + $0x90] sm:$0xff] %v860_v50  ;;  %v862_v52 = vadd.f32 %v861_v51, %v1569_v13 }
 0x1e8   :  { %v865_v53 = vpop.f32.mrf.mxu1 }
 0x1e9   :  { %963 = vst [vmem:[#allocation3 + $0x98] sm:$0xff] %v862_v52  ;;  %v866_v54 = vadd.f32 %v865_v53, %v1567_v12 }
 0x1ea   :  { %v867_v55 = vpop.f32.mrf.mxu1 }
 0x1eb   :  { %964 = vst [vmem:[#allocation3 + $0xa0] sm:$0xff] %v866_v54  ;;  %v868_v56 = vadd.f32 %v867_v55, %v1569_v13 }
 0x1ec   :  { %v869_v57 = vpop.f32.mrf.mxu1 }
 0x1ed   :  { %965 = vst [vmem:[#allocation3 + $0xa8] sm:$0xff] %v868_v56  ;;  %v870_v58 = vadd.f32 %v869_v57, %v1567_v12 }
 0x1ee   :  { %v871_v59 = vpop.f32.mrf.mxu1 }
 0x1ef   :  { %966 = vst [vmem:[#allocation3 + $0xb0] sm:$0xff] %v870_v58  ;;  %v872_v60 = vadd.f32 %v871_v59, %v1569_v13 }
 0x1f0   :  { %v875_v61 = vpop.f32.mrf.mxu1 }
 0x1f1   :  { %967 = vst [vmem:[#allocation3 + $0xb8] sm:$0xff] %v872_v60  ;;  %v876_v62 = vadd.f32 %v875_v61, %v1567_v12 }
 0x1f2   :  { %v877_v63 = vpop.f32.mrf.mxu1 }
 0x1f3   :  { %968 = vst [vmem:[#allocation3 + $0xc0] sm:$0xff] %v876_v62  ;;  %v878_v0 = vadd.f32 %v877_v63, %v1569_v13 }
 0x1f4   :  { %v879_v2 = vpop.f32.mrf.mxu1 }
 0x1f5   :  { %969 = vst [vmem:[#allocation3 + $0xc8] sm:$0xff] %v878_v0  ;;  %v880_v3 = vadd.f32 %v879_v2, %v1567_v12 }
 0x1f6   :  { %v881_v4 = vpop.f32.mrf.mxu1 }
 0x1f7   :  { %970 = vst [vmem:[#allocation3 + $0xd0] sm:$0xff] %v880_v3  ;;  %v882_v5 = vadd.f32 %v881_v4, %v1569_v13 }
 0x1f8   :  { %v885_v6 = vpop.f32.mrf.mxu1 }
 0x1f9   :  { %971 = vst [vmem:[#allocation3 + $0xd8] sm:$0xff] %v882_v5  ;;  %v886_v7 = vadd.f32 %v885_v6, %v1567_v12 }
 0x1fa   :  { %v887_v8 = vpop.f32.mrf.mxu1 }
 0x1fb   :  { %972 = vst [vmem:[#allocation3 + $0xe0] sm:$0xff] %v886_v7  ;;  %v888_v9 = vadd.f32 %v887_v8, %v1569_v13 }
 0x1fc   :  { %v889_v10 = vpop.f32.mrf.mxu1 }
 0x1fd   :  { %973 = vst [vmem:[#allocation3 + $0xe8] sm:$0xff] %v888_v9  ;;  %v890_v11 = vadd.f32 %v889_v10, %v1567_v12 }
 0x1fe   :  { %v891_v14 = vpop.f32.mrf.mxu1 }
 0x1ff   :  { %974 = vst [vmem:[#allocation3 + $0xf0] sm:$0xff] %v890_v11  ;;  %v892_v15 = vadd.f32 %v891_v14, %v1569_v13 }
 0x200   :  { %v895_v16 = vpop.f32.mrf.mxu1 }
 0x201   :  { %975 = vst [vmem:[#allocation3 + $0xf8] sm:$0xff] %v892_v15  ;;  %v896_v1 = vadd.f32 %v895_v16, %v1567_v12 }
 0x202   :  { %v897_v17 = vpop.f32.mrf.mxu1 }
 0x203   :  { %976 = vst [vmem:[#allocation3 + $0x100] sm:$0xff] %v896_v1  ;;  %v898_v18 = vadd.f32 %v897_v17, %v1569_v13 }
 0x204   :  { %v899_v19 = vpop.f32.mrf.mxu1 }
 0x205   :  { %977 = vst [vmem:[#allocation3 + $0x108] sm:$0xff] %v898_v18  ;;  %v900_v20 = vadd.f32 %v899_v19, %v1567_v12 }
 0x206   :  { %v901_v21 = vpop.f32.mrf.mxu1 }
 0x207   :  { %978 = vst [vmem:[#allocation3 + $0x110] sm:$0xff] %v900_v20  ;;  %v902_v22 = vadd.f32 %v901_v21, %v1569_v13 }
 0x208   :  { %v905_v23 = vpop.f32.mrf.mxu1 }
 0x209   :  { %979 = vst [vmem:[#allocation3 + $0x118] sm:$0xff] %v902_v22  ;;  %v906_v24 = vadd.f32 %v905_v23, %v1567_v12 }
 0x20a   :  { %v907_v25 = vpop.f32.mrf.mxu1 }
 0x20b   :  { %980 = vst [vmem:[#allocation3 + $0x120] sm:$0xff] %v906_v24  ;;  %v908_v26 = vadd.f32 %v907_v25, %v1569_v13 }
 0x20c   :  { %v909_v27 = vpop.f32.mrf.mxu1 }
 0x20d   :  { %981 = vst [vmem:[#allocation3 + $0x128] sm:$0xff] %v908_v26  ;;  %v910_v28 = vadd.f32 %v909_v27, %v1567_v12 }
 0x20e   :  { %v911_v29 = vpop.f32.mrf.mxu1 }
 0x20f   :  { %982 = vst [vmem:[#allocation3 + $0x130] sm:$0xff] %v910_v28  ;;  %v912_v30 = vadd.f32 %v911_v29, %v1569_v13 }
 0x210   :  { %v915_v31 = vpop.f32.mrf.mxu1 }
 0x211   :  { %983 = vst [vmem:[#allocation3 + $0x138] sm:$0xff] %v912_v30  ;;  %v916_v32 = vadd.f32 %v915_v31, %v1567_v12 }
 0x212   :  { %v917_v33 = vpop.f32.mrf.mxu1 }
 0x213   :  { %984 = vst [vmem:[#allocation3 + $0x140] sm:$0xff] %v916_v32  ;;  %v918_v34 = vadd.f32 %v917_v33, %v1569_v13 }
 0x214   :  { %v919_v35 = vpop.f32.mrf.mxu1 }
 0x215   :  { %985 = vst [vmem:[#allocation3 + $0x148] sm:$0xff] %v918_v34  ;;  %v920_v36 = vadd.f32 %v919_v35, %v1567_v12 }
 0x216   :  { %v921_v37 = vpop.f32.mrf.mxu1 }
 0x217   :  { %986 = vst [vmem:[#allocation3 + $0x150] sm:$0xff] %v920_v36  ;;  %v922_v38 = vadd.f32 %v921_v37, %v1569_v13 }
 0x218   :  { %v925_v39 = vpop.f32.mrf.mxu1 }
 0x219   :  { %987 = vst [vmem:[#allocation3 + $0x158] sm:$0xff] %v922_v38  ;;  %v926_v40 = vadd.f32 %v925_v39, %v1567_v12 }
 0x21a   :  { %v927_v41 = vpop.f32.mrf.mxu1 }
 0x21b   :  { %988 = vst [vmem:[#allocation3 + $0x160] sm:$0xff] %v926_v40  ;;  %v928_v42 = vadd.f32 %v927_v41, %v1569_v13 }
 0x21c   :  { %v929_v43 = vpop.f32.mrf.mxu1 }
 0x21d   :  { %989 = vst [vmem:[#allocation3 + $0x168] sm:$0xff] %v928_v42  ;;  %v930_v44 = vadd.f32 %v929_v43, %v1567_v12 }
 0x21e   :  { %v931_v45 = vpop.f32.mrf.mxu1 }
 0x21f   :  { %990 = vst [vmem:[#allocation3 + $0x170] sm:$0xff] %v930_v44  ;;  %v932_v46 = vadd.f32 %v931_v45, %v1569_v13 }
 0x220   :  { %v935_v47 = vpop.f32.mrf.mxu1 }
 0x221   :  { %991 = vst [vmem:[#allocation3 + $0x178] sm:$0xff] %v932_v46  ;;  %v936_v48 = vadd.f32 %v935_v47, %v1567_v12 }
 0x222   :  { %v937_v49 = vpop.f32.mrf.mxu1 }
 0x223   :  { %992 = vst [vmem:[#allocation3 + $0x180] sm:$0xff] %v936_v48  ;;  %v938_v50 = vadd.f32 %v937_v49, %v1569_v13 }
 0x224   :  { %v939_v51 = vpop.f32.mrf.mxu1 }
 0x225   :  { %993 = vst [vmem:[#allocation3 + $0x188] sm:$0xff] %v938_v50  ;;  %v940_v52 = vadd.f32 %v939_v51, %v1567_v12 }
 0x226   :  { %v941_v53 = vpop.f32.mrf.mxu1 }
 0x227   :  { %994 = vst [vmem:[#allocation3 + $0x190] sm:$0xff] %v940_v52  ;;  %v942_v54 = vadd.f32 %v941_v53, %v1569_v13 }
 0x229   :  { %995 = vst [vmem:[#allocation3 + $0x198] sm:$0xff] %v942_v54 }
 0x22a   :  { %1324 = shalt.err (!%p1321_p4)
}
 0x22b   :  { %s1337_s18 = smov 256   ;;  %s1338_s19 = smov 16  }
 0x22c   :  { %1007 = dma.vmem_to_hbm [thread:$0]  %s1002_s16, 6656, %s1630_s4, [#allocation4], %s1337_s18, %s1337_s18, %s1338_s19  }
 0x22d   :  { %1333 = dma.done.wait [#allocation4], 6656  }
 0x22e   :  { %1334 = vsyncadd [#allocation4], 4294960640 }
 0x22f   :  { %1011 = vsyncpa [#allocation4], 1 }

</bundles_post_ra>
